<compile_context>
chip_gen: v5e
topology: v5e:2x2
jax: 0.10.0
libtpu: 0.0.40
codegen_flags: <defaults>
</compile_context>

<pallas_src>
import jax
import jax.numpy as jnp
from jax.experimental import pallas as pl
from jax.experimental.pallas import tpu as pltpu

VMEM_SPEC = pl.BlockSpec(memory_space=pltpu.MemorySpace.VMEM)


def _round_up(x, m):
    return -(-x // m) * m


# ---------------------------------------------------------------------------
# Fully fused CCXN forward kernel (att=False)
# ---------------------------------------------------------------------------
def _make_ccxn_kernel(n_layers, C, R, n_nodes, n_edges, n_faces,
                      x1_row_off, bias_row_off):
    inv_n0 = 1.0 / n_nodes
    inv_n1 = 1.0 / n_edges
    inv_n2 = 1.0 / n_faces

    def kernel(acts_ref, n00_ref, n12_ref, params_ref, o_ref):
        # bf16 0/1 neighborhoods -> exact f32 (one upcast each)
        n00 = n00_ref[...].astype(jnp.float32)
        n12 = n12_ref[...].astype(jnp.float32)

        def wblk(i):  # i-th R-row parameter block, [C, C]
            return params_ref[pl.ds(i * R, C), :]

        # relu once: relu is idempotent, and layer outputs are already >= 0.
        x0 = jnp.maximum(acts_ref[pl.ds(0, n_nodes), :], 0.0)
        x1r = jnp.maximum(acts_ref[pl.ds(x1_row_off, n_edges), :], 0.0)

        # x_0 path through all layers: x0 = relu(N00 @ (x0 @ W0_l))
        for l in range(n_layers):
            msg0 = jnp.dot(x0, wblk(l), preferred_element_type=jnp.float32)
            x0 = jnp.maximum(
                jnp.dot(n00, msg0, preferred_element_type=jnp.float32), 0.0)

        # x_2 path: x_1 is constant across layers, so only the last layer's
        # x_2 reaches the readout (earlier x_2 are dead values).
        msg1 = jnp.dot(x1r, wblk(n_layers), preferred_element_type=jnp.float32)
        x2 = jnp.maximum(
            jnp.dot(n12, msg1, preferred_element_type=jnp.float32), 0.0)

        # Readout: mean_rows(x @ W + b) == (sum_rows(x)/n) @ W + b.
        # No NaNs possible for finite inputs (everything is post-ReLU with
        # finite weights), so nanmean == mean.
        # TODO(synk): restore nanmean/isnan path if NaN inputs are possible.
        s0 = jnp.sum(x0, axis=0, keepdims=True) * inv_n0
        s1 = jnp.sum(x1r, axis=0, keepdims=True) * inv_n1
        s2 = jnp.sum(x2, axis=0, keepdims=True) * inv_n2

        bias = params_ref[pl.ds(bias_row_off, 1), :]       # b0 + b1 + b2
        o_ref[...] = (
            jnp.dot(s0, wblk(n_layers + 1), preferred_element_type=jnp.float32)
            + jnp.dot(s1, wblk(n_layers + 2), preferred_element_type=jnp.float32)
            + jnp.dot(s2, wblk(n_layers + 3), preferred_element_type=jnp.float32)
            + bias)

    return kernel


# ---------------------------------------------------------------------------
# One-time parameter packing (done at init, NOT per forward call)
# ---------------------------------------------------------------------------
def pack_params(layers, lin, C, R):
    def pad_block(a):
        a = jnp.asarray(a, jnp.float32)
        return jnp.pad(a, ((0, R - a.shape[0]), (0, C - a.shape[1])))

    blocks = [pad_block(wc0) for (wc0, _) in layers]       # conv_0_to_0, all layers
    blocks.append(pad_block(layers[-1][1]))                # conv_1_to_2, last layer only
    bias_sum = jnp.zeros((1, lin[0][1].shape[1]), jnp.float32)
    for (w, b) in lin:
        blocks.append(pad_block(w))                        # pre-transposed [cin, nc]
        bias_sum = bias_sum + b
    blocks.append(pad_block(bias_sum))                     # b0 + b1 + b2
    return jnp.concatenate(blocks, axis=0)                 # [(n_layers+5)*R, C]


# ---------------------------------------------------------------------------
# Forward wrapper (single jitted dispatch -> single pallas_call)
# ---------------------------------------------------------------------------
def make_ccxn_forward(n_layers, c0, c1, c2, num_classes,
                      n_nodes, n_edges, n_faces):
    C = max(c0, c1, c2, num_classes)
    R = _round_up(C, 8)
    x1_row_off = _round_up(n_nodes, 8)     # keep x_1 block sublane-aligned
    bias_row_off = (n_layers + 4) * R

    kernel = _make_ccxn_kernel(n_layers, C, R, n_nodes, n_edges, n_faces,
                               x1_row_off, bias_row_off)

    # advisory cost estimate (true dims, not 128-padded)
    flops = 0
    for _ in range(n_layers):
        flops += 2 * n_nodes * C * C + 2 * n_nodes * n_nodes * C   # conv_0_to_0
    flops += 2 * n_edges * C * C + 2 * n_faces * n_edges * C       # conv_1_to_2
    flops += 3 * 2 * C * C                                         # readout GEMVs
    acts_rows = x1_row_off + n_edges
    params_rows = (n_layers + 5) * R
    bytes_accessed = (acts_rows * C * 4 + n_nodes * n_nodes * 2
                      + n_faces * n_edges * 2 + params_rows * C * 4 + C * 4)
    cost = pl.CostEstimate(flops=flops, transcendentals=0,
                           bytes_accessed=bytes_accessed)

    @jax.jit
    def forward(x0, x1, n00, n12, params):
        # Build the activation slab (x0 ++ x1, column-padded to C) — fused
        # into this single jitted computation, not separate dispatches.
        x0p = jnp.pad(x0.astype(jnp.float32),
                      ((0, x1_row_off - n_nodes), (0, C - c0)))
        x1p = jnp.pad(x1.astype(jnp.float32), ((0, 0), (0, C - c1)))
        acts = jnp.concatenate([x0p, x1p], axis=0)

        out = pl.pallas_call(
            kernel,
            out_shape=jax.ShapeDtypeStruct((1, C), jnp.float32),
            in_specs=[VMEM_SPEC] * 4,
            out_specs=VMEM_SPEC,
            cost_estimate=cost,
        )(acts, n00.astype(jnp.bfloat16), n12.astype(jnp.bfloat16), params)
        return out[0, :num_classes]

    return forward


# ---------------------------------------------------------------------------
# Parameter init (deterministic, synthetic — no checkpoint load)
# ---------------------------------------------------------------------------
def xavier_uniform(key, shape, gain=1.0):
    fan_in, fan_out = shape
    a = gain * (6.0 / (fan_in + fan_out)) ** 0.5
    return jax.random.uniform(key, shape, jnp.float32, -a, a)


def init_params(key, c0, c1, c2, num_classes, n_layers=2):
    layers = []
    for _ in range(n_layers):
        key, k1, k2 = jax.random.split(key, 3)
        layers.append((xavier_uniform(k1, (c0, c0), gain=1.414),   # conv_0_to_0
                       xavier_uniform(k2, (c1, c2), gain=1.414)))  # conv_1_to_2
    lin = []
    for cin in (c0, c1, c2):
        key, kw, kb = jax.random.split(key, 3)
        w = xavier_uniform(kw, (cin, num_classes), gain=1.0)       # pre-transposed
        b = jax.random.uniform(kb, (1, num_classes), jnp.float32, -0.1, 0.1)
        lin.append((w, b))
    return layers, lin


# ---------------------------------------------------------------------------
# Pure-JAX reference (mirrors the torch module, att=False)
# ---------------------------------------------------------------------------
def ccxn_reference(x0, x1, n00, n12, layers, lin):
    x2 = None
    for (w_conv0, w_conv1) in layers:
        x0 = jax.nn.relu(x0)
        x1 = jax.nn.relu(x1)
        x0 = jax.nn.relu(n00 @ (x0 @ w_conv0))
        x2 = jax.nn.relu(n12 @ (x1 @ w_conv1))
    (w0, b0), (w1, b1), (w2, b2) = lin

    def nm(y):
        m = jnp.nanmean(y, axis=0)
        return jnp.where(jnp.isnan(m), 0.0, m)

    return nm(x2 @ w2 + b2) + nm(x1 @ w1 + b1) + nm(x0 @ w0 + b0)


if __name__ == "__main__":
    # TODO(synk): att=True attention branch of CCXNLayer not implemented
    # (module default is att=False and the given forward never passes x_2).
    n_nodes, n_edges, n_faces = 16, 32, 8
    c0, c1, c2, num_classes, n_layers = 8, 8, 8, 4, 2

    key = jax.random.PRNGKey(0)
    k = jax.random.split(key, 5)
    x0 = jax.random.normal(k[0], (n_nodes, c0), jnp.float32)
    x1 = jax.random.normal(k[1], (n_edges, c1), jnp.float32)
    n00 = (jax.random.uniform(k[2], (n_nodes, n_nodes)) > 0.7).astype(jnp.float32)
    n12 = (jax.random.uniform(k[3], (n_faces, n_edges)) > 0.8).astype(jnp.float32)
    layers, lin = init_params(k[4], c0, c1, c2, num_classes, n_layers)

    # One-time parameter packing (not on the per-call path).
    C = max(c0, c1, c2, num_classes)
    R = _round_up(C, 8)
    params = pack_params(layers, lin, C, R)

    forward = make_ccxn_forward(n_layers, c0, c1, c2, num_classes,
                                n_nodes, n_edges, n_faces)
    out = jax.block_until_ready(forward(x0, x1, n00, n12, params))

    ref = ccxn_reference(x0, x1, n00, n12, layers, lin)
    assert out.shape == (num_classes,), out.shape
    assert jnp.allclose(out, ref, atol=1e-5, rtol=1e-5), (out, ref)
    print("KERNEL_OK")
</pallas_src>

<mosaic_0001>
module attributes {stable_mosaic.version = 11 : i64} {
  func.func @kernel(%arg0: memref<48x8xf32, #tpu.memory_space<vmem>>, %arg1: memref<16x16xbf16, #tpu.memory_space<vmem>>, %arg2: memref<8x32xbf16, #tpu.memory_space<vmem>>, %arg3: memref<56x8xf32, #tpu.memory_space<vmem>>, %arg4: memref<1x8xf32, #tpu.memory_space<vmem>>) attributes {dimension_semantics = [], scalar_prefetch = 0 : i64, scratch_operands = 0 : i64, tpu.core_type = #tpu.core_type<tc>} {
    %c0 = arith.constant 0 : index
    %c0_0 = arith.constant 0 : index
    %0 = vector.load %arg1[%c0, %c0_0] : memref<16x16xbf16, #tpu.memory_space<vmem>>, vector<16x16xbf16>
    %1 = arith.extf %0 : vector<16x16xbf16> to vector<16x16xf32>
    %c0_1 = arith.constant 0 : index
    %c0_2 = arith.constant 0 : index
    %2 = vector.load %arg2[%c0_1, %c0_2] : memref<8x32xbf16, #tpu.memory_space<vmem>>, vector<8x32xbf16>
    %3 = arith.extf %2 : vector<8x32xbf16> to vector<8x32xf32>
    %c0_3 = arith.constant 0 : index
    %c0_4 = arith.constant 0 : index
    %4 = vector.load %arg0[%c0_3, %c0_4] : memref<48x8xf32, #tpu.memory_space<vmem>>, vector<16x8xf32>
    %cst = arith.constant 0.000000e+00 : f32
    %5 = vector.broadcast %cst : f32 to vector<16x8xf32>
    %6 = arith.maximumf %4, %5 : vector<16x8xf32>
    %c16 = arith.constant 16 : index
    %c0_5 = arith.constant 0 : index
    %7 = vector.load %arg0[%c16, %c0_5] : memref<48x8xf32, #tpu.memory_space<vmem>>, vector<32x8xf32>
    %cst_6 = arith.constant 0.000000e+00 : f32
    %8 = vector.broadcast %cst_6 : f32 to vector<32x8xf32>
    %9 = arith.maximumf %7, %8 : vector<32x8xf32>
    %c0_7 = arith.constant 0 : index
    %c0_8 = arith.constant 0 : index
    %10 = vector.load %arg3[%c0_7, %c0_8] : memref<56x8xf32, #tpu.memory_space<vmem>>, vector<8x8xf32>
    %cst_9 = arith.constant dense<0.000000e+00> : vector<16x8xf32>
    %11 = tpu.matmul %6, %10, %cst_9 {dimension_numbers = #tpu.dot_dimension_numbers<[1], [0], [0], [1], [0, 0, 1, 1], [], []>} : vector<16x8xf32>, vector<8x8xf32>, vector<16x8xf32> -> vector<16x8xf32>
    %cst_10 = arith.constant dense<0.000000e+00> : vector<16x8xf32>
    %12 = tpu.matmul %1, %11, %cst_10 {dimension_numbers = #tpu.dot_dimension_numbers<[1], [0], [0], [1], [0, 0, 1, 1], [], []>} : vector<16x16xf32>, vector<16x8xf32>, vector<16x8xf32> -> vector<16x8xf32>
    %cst_11 = arith.constant 0.000000e+00 : f32
    %13 = vector.broadcast %cst_11 : f32 to vector<16x8xf32>
    %14 = arith.maximumf %12, %13 : vector<16x8xf32>
    %c8 = arith.constant 8 : index
    %c0_12 = arith.constant 0 : index
    %15 = vector.load %arg3[%c8, %c0_12] : memref<56x8xf32, #tpu.memory_space<vmem>>, vector<8x8xf32>
    %cst_13 = arith.constant dense<0.000000e+00> : vector<16x8xf32>
    %16 = tpu.matmul %14, %15, %cst_13 {dimension_numbers = #tpu.dot_dimension_numbers<[1], [0], [0], [1], [0, 0, 1, 1], [], []>} : vector<16x8xf32>, vector<8x8xf32>, vector<16x8xf32> -> vector<16x8xf32>
    %cst_14 = arith.constant dense<0.000000e+00> : vector<16x8xf32>
    %17 = tpu.matmul %1, %16, %cst_14 {dimension_numbers = #tpu.dot_dimension_numbers<[1], [0], [0], [1], [0, 0, 1, 1], [], []>} : vector<16x16xf32>, vector<16x8xf32>, vector<16x8xf32> -> vector<16x8xf32>
    %cst_15 = arith.constant 0.000000e+00 : f32
    %18 = vector.broadcast %cst_15 : f32 to vector<16x8xf32>
    %19 = arith.maximumf %17, %18 : vector<16x8xf32>
    %c16_16 = arith.constant 16 : index
    %c0_17 = arith.constant 0 : index
    %20 = vector.load %arg3[%c16_16, %c0_17] : memref<56x8xf32, #tpu.memory_space<vmem>>, vector<8x8xf32>
    %cst_18 = arith.constant dense<0.000000e+00> : vector<32x8xf32>
    %21 = tpu.matmul %9, %20, %cst_18 {dimension_numbers = #tpu.dot_dimension_numbers<[1], [0], [0], [1], [0, 0, 1, 1], [], []>} : vector<32x8xf32>, vector<8x8xf32>, vector<32x8xf32> -> vector<32x8xf32>
    %cst_19 = arith.constant dense<0.000000e+00> : vector<8x8xf32>
    %22 = tpu.matmul %3, %21, %cst_19 {dimension_numbers = #tpu.dot_dimension_numbers<[1], [0], [0], [1], [0, 0, 1, 1], [], []>} : vector<8x32xf32>, vector<32x8xf32>, vector<8x8xf32> -> vector<8x8xf32>
    %cst_20 = arith.constant 0.000000e+00 : f32
    %23 = vector.broadcast %cst_20 : f32 to vector<8x8xf32>
    %24 = arith.maximumf %22, %23 : vector<8x8xf32>
    %cst_21 = arith.constant dense<0.000000e+00> : vector<8xf32>
    %25 = vector.multi_reduction <add>, %19, %cst_21 [0] : vector<16x8xf32> to vector<8xf32>
    %26 = vector.shape_cast %25 : vector<8xf32> to vector<1x8xf32>
    %cst_22 = arith.constant 6.250000e-02 : f32
    %27 = vector.broadcast %cst_22 : f32 to vector<1x8xf32>
    %28 = arith.mulf %26, %27 : vector<1x8xf32>
    %cst_23 = arith.constant dense<0.000000e+00> : vector<8xf32>
    %29 = vector.multi_reduction <add>, %9, %cst_23 [0] : vector<32x8xf32> to vector<8xf32>
    %30 = vector.shape_cast %29 : vector<8xf32> to vector<1x8xf32>
    %cst_24 = arith.constant 3.125000e-02 : f32
    %31 = vector.broadcast %cst_24 : f32 to vector<1x8xf32>
    %32 = arith.mulf %30, %31 : vector<1x8xf32>
    %cst_25 = arith.constant dense<0.000000e+00> : vector<8xf32>
    %33 = vector.multi_reduction <add>, %24, %cst_25 [0] : vector<8x8xf32> to vector<8xf32>
    %34 = vector.shape_cast %33 : vector<8xf32> to vector<1x8xf32>
    %cst_26 = arith.constant 1.250000e-01 : f32
    %35 = vector.broadcast %cst_26 : f32 to vector<1x8xf32>
    %36 = arith.mulf %34, %35 : vector<1x8xf32>
    %c48 = arith.constant 48 : index
    %c0_27 = arith.constant 0 : index
    %37 = vector.load %arg3[%c48, %c0_27] : memref<56x8xf32, #tpu.memory_space<vmem>>, vector<1x8xf32>
    %c24 = arith.constant 24 : index
    %c0_28 = arith.constant 0 : index
    %38 = vector.load %arg3[%c24, %c0_28] : memref<56x8xf32, #tpu.memory_space<vmem>>, vector<8x8xf32>
    %cst_29 = arith.constant dense<0.000000e+00> : vector<1x8xf32>
    %39 = tpu.matmul %28, %38, %cst_29 {dimension_numbers = #tpu.dot_dimension_numbers<[1], [0], [0], [1], [0, 0, 1, 1], [], []>} : vector<1x8xf32>, vector<8x8xf32>, vector<1x8xf32> -> vector<1x8xf32>
    %c32 = arith.constant 32 : index
    %c0_30 = arith.constant 0 : index
    %40 = vector.load %arg3[%c32, %c0_30] : memref<56x8xf32, #tpu.memory_space<vmem>>, vector<8x8xf32>
    %cst_31 = arith.constant dense<0.000000e+00> : vector<1x8xf32>
    %41 = tpu.matmul %32, %40, %cst_31 {dimension_numbers = #tpu.dot_dimension_numbers<[1], [0], [0], [1], [0, 0, 1, 1], [], []>} : vector<1x8xf32>, vector<8x8xf32>, vector<1x8xf32> -> vector<1x8xf32>
    %42 = arith.addf %39, %41 : vector<1x8xf32>
    %c40 = arith.constant 40 : index
    %c0_32 = arith.constant 0 : index
    %43 = vector.load %arg3[%c40, %c0_32] : memref<56x8xf32, #tpu.memory_space<vmem>>, vector<8x8xf32>
    %cst_33 = arith.constant dense<0.000000e+00> : vector<1x8xf32>
    %44 = tpu.matmul %36, %43, %cst_33 {dimension_numbers = #tpu.dot_dimension_numbers<[1], [0], [0], [1], [0, 0, 1, 1], [], []>} : vector<1x8xf32>, vector<8x8xf32>, vector<1x8xf32> -> vector<1x8xf32>
    %45 = arith.addf %42, %44 : vector<1x8xf32>
    %46 = arith.addf %45, %37 : vector<1x8xf32>
    %c0_34 = arith.constant 0 : index
    %c0_35 = arith.constant 0 : index
    %47 = vector.load %arg4[%c0_34, %c0_35] : memref<1x8xf32, #tpu.memory_space<vmem>>, vector<1x8xf32>
    tpu.vector_store %arg4[%c0_34, %c0_35], %46 {strides = array<i32>} : memref<1x8xf32, #tpu.memory_space<vmem>>, vector<1x8xf32>,
    return
  }
}

</mosaic_0001>

<bundles_post_ra>
// kernel: forward.1
= control target key start
LH: loop header
LB: loop body
LE: loop exit
PB: predicated region body
PF: predicated region fallthrough
CT: control target
= control target key end

     0   :  { %vm36_vm0 = vcmask 64512   ;;  %vm66_vm1 = vcmask 130048   ;;  %vm195_vm2 = vcmask 261120   ;;  %vm327_vm3 = vcmask 57344   ;;  %s449_s3 = inlined_call_operand.vmem [shape: f32[56,8], index: 3, kind: input, shape index: {}]   ;;  %s450_s0 = inlined_call_operand.vmem [shape: f32[48,8], index: 0, kind: input, shape index: {}]   ;;  %s451_s1 = inlined_call_operand.vmem [shape: bf16[16,16], index: 1, kind: input, shape index: {}]   ;;  %s452_s2 = inlined_call_operand.vmem [shape: bf16[8,32], index: 2, kind: input, shape index: {}]   ;;  %s453_s4 = inlined_call_operand.vmem [shape: f32[1,8], index: 4, kind: output, shape index: {}]  }
   0x1   :  { %v35_v0 = vld [vmem:[%s449_s3] sm:$0xff]  ;;  %v24_v1 = vld [vmem:[%s450_s0 + $0x8] sm:$0xff]  ;;  %v153_v5 = vld [vmem:[%s449_s3 + $0x10] sm:$0xff] }
   0x2   :  { %v23_v2 = vld [vmem:[%s450_s0] sm:$0xff]  ;;  %353 = vmatpush.msra.mxu3 %v35_v0  ;;  %v26_v3 = vmax.f32 %v24_v1, 0.0  ;;  %58 = vmatpush.msra.mxu1 %v35_v0  ;;  %v27_v6 = vld [vmem:[%s450_s0 + $0x10] sm:$0xff]  ;;  %v28_v7 = vld [vmem:[%s450_s0 + $0x18] sm:$0xff] }
   0x3   :  { %v25_v4 = vmax.f32 %v23_v2, 0.0  ;;  %181 = vmatpush.msra.mxu0 %v153_v5  ;;  %v31_v8 = vmax.f32 %v27_v6, 0.0  ;;  %v32_v9 = vmax.f32 %v28_v7, 0.0  ;;  %v29_v10 = vld [vmem:[%s450_s0 + $0x20] sm:$0xff]  ;;  %v30_v11 = vld [vmem:[%s450_s0 + $0x28] sm:$0xff]  ;;  %v253_v55 = vld [vmem:[%s449_s3 + $0x18] sm:$0xff] }
   0x4   :  { %334 = vmatmul.msk.f32.vlgmr.msra.gmra.mxu3 %vm36_vm0, %v26_v3  ;;  %v33_v12 = vmax.f32 %v29_v10, 0.0  ;;  %v34_v15 = vmax.f32 %v30_v11, 0.0  ;;  %v350_v21 = vld [vmem:[%s451_s1] sm:$0xff]   ;;  %v98_v26 = vld [vmem:[%s449_s3 + $0x8] sm:$0xff] }
   0x5   :  { %333 = vmatmul.msk.f32.vlgmr.msra.gmra.mxu1 %vm36_vm0, %v25_v4  ;;  %341 = vmatmul.msk.f32.vlgmr.msra.gmra.mxu0 %vm36_vm0, %v31_v8  ;;  %v230_v13 = vsel %vm36_vm0, %v31_v8, 0.0  ;;  %v231_v14 = vsel %vm36_vm0, %v32_v9, 0.0  ;;  %v351_v24 = vunpack.c.l.bf16 %v350_v21  ;;  %v352_v25 = vunpack.c.h.bf16 %v350_v21  ;;  %v21_v35 = vld [vmem:[%s452_s2] sm:$0xf]  ;;  %v301_v53 = vld [vmem:[%s449_s3 + $0x28] sm:$0xff] }
   0x6   :  { %v232_v16 = vadd.f32 %v231_v14, %v230_v13  ;;  %v233_v17 = vsel %vm36_vm0, %v33_v12, 0.0  ;;  %v235_v18 = vsel %vm36_vm0, %v34_v15, 0.0  ;;  %120 = vmatpush.msra.mxu2 %v98_v26  ;;  %v22_v36 = vunpack.c.l.bf16 %v21_v35  ;;  %v254_v56 = vld [vmem:[%s449_s3 + $0x20] sm:$0xff] }
   0x8   :  { %v234_v19 = vadd.f32 %v233_v17, %v232_v16 }
   0xa   :  { %v236_v20 = vadd.f32 %v235_v18, %v234_v19 }
   0xc   :  { %v237_v41 = vrot.slane %v236_v20, 4 }
   0xd   :  { %342 = vmatmul.msk.f32.gmra.mxu0 %vm36_vm0, %v32_v9 }
   0xe   :  { %v238_v44 = vadd.f32 %v237_v41, %v236_v20 }
  0x10   :  { %v239_v47 = vrot.slane %v238_v44, 2 }
  0x12   :  { %v240_v50 = vadd.f32 %v239_v47, %v238_v44 }
  0x14   :  { %v241_v54 = vrot.slane %v240_v50, 1 }
  0x15   :  { %343 = vmatmul.msk.f32.gmra.mxu0 %vm36_vm0, %v33_v12  ;;  %v252_v12 = vld [vmem:[%s449_s3 + $0x30] sm:$0x1] }
  0x16   :  { %v242_v57 = vadd.f32 %v241_v54, %v240_v50 }
  0x18   :  { %v243_v58 = vmul.f32 0.03125, %v242_v57 }
  0x1d   :  { %344 = vmatmul.msk.f32.gmra.mxu0 %vm36_vm0, %v34_v15 }
  0x82   :  { %v60_v23 = vpop.f32.mrf.mxu1  ;;  %v183_v27 = vpop.f32.mrf.mxu0 }
  0x87   :  { %v63_v22 = vpop.f32.mrf.mxu3 }
  0x88   :  { %87 = vmatpush.msrb.mxu1 %v63_v22 }
  0x8a   :  { %88 = vmatpush.msrb.mxu1 %v60_v23  ;;  %v186_v28 = vpop.f32.mrf.mxu0 }
  0x8b   :  { %335 = vmatmul.msk.f32.vlgmr.msrb.gmra.mxu1 %vm66_vm1, %v351_v24 }
  0x8c   :  { %273 = vmatpush.msra.mxu1 %v254_v56 }
  0x92   :  { %v189_v29 = vpop.f32.mrf.mxu0 }
  0x93   :  { %336 = vmatmul.msk.f32.gmra.mxu1 %vm66_vm1, %v352_v25 }
  0x9a   :  { %v192_v32 = vpop.f32.mrf.mxu0 }
  0x9b   :  { %211 = vmatpush.msrb.mxu2 %v192_v32  ;;  %346 = vmatmul.msk.f32.vlgmr.msra.gmra.mxu1 %vm36_vm0, %v243_v58 }
  0x9d   :  { %212 = vmatpush.msrb.mxu2 %v189_v29 }
  0x9f   :  { %213 = vmatpush.msrb.mxu2 %v186_v28 }
  0xa1   :  { %214 = vmatpush.msrb.mxu2 %v183_v27 }
 0x108   :  { %v90_v30 = vpop.f32.mrf.mxu1 }
 0x109   :  { %v96_v31 = vmax.f32 %v90_v30, 0.0 }
 0x10b   :  { %337 = vmatmul.msk.f32.vlgmr.msra.gmra.mxu2 %vm36_vm0, %v96_v31 }
 0x10c   :  { %320 = vmatpush.msra.mxu2 %v301_v53 }
 0x110   :  { %v93_v33 = vpop.f32.mrf.mxu1 }
 0x111   :  { %v97_v34 = vmax.f32 %v93_v33, 0.0 }
 0x113   :  { %338 = vmatmul.msk.f32.gmra.mxu2 %vm36_vm0, %v97_v34 }
 0x118   :  { %v275_v9 = vpop.f32.mrf.mxu1 }
 0x11b   :  { %345 = vmatmul.msk.f32.vlgmr.msrb.gmra.mxu2 %vm195_vm2, %v22_v36 }
 0x18e   :  { %v122_v37 = vpop.f32.mrf.mxu2 }
 0x196   :  { %v125_v38 = vpop.f32.mrf.mxu2 }
 0x197   :  { %142 = vmatpush.msrb.mxu3 %v125_v38 }
 0x199   :  { %143 = vmatpush.msrb.mxu3 %v122_v37 }
 0x19a   :  { %339 = vmatmul.msk.f32.vlgmr.msrb.gmra.mxu3 %vm66_vm1, %v351_v24 }
 0x19b   :  { %296 = vmatpush.msra.mxu3 %v253_v55 }
 0x19e   :  { %v216_v39 = vpop.f32.mrf.mxu2 }
 0x19f   :  { %v219_v40 = vmax.f32 %v216_v39, 0.0 }
 0x1a1   :  { %v244_v42 = vsel %vm36_vm0, %v219_v40, 0.0 }
 0x1a2   :  { %340 = vmatmul.msk.f32.gmra.mxu3 %vm66_vm1, %v352_v25  ;;  %v245_v43 = vrot.slane %v244_v42, 4 }
 0x1a4   :  { %v246_v45 = vadd.f32 %v245_v43, %v244_v42 }
 0x1a6   :  { %v247_v46 = vrot.slane %v246_v45, 2 }
 0x1a8   :  { %v248_v48 = vadd.f32 %v247_v46, %v246_v45 }
 0x1aa   :  { %v249_v49 = vrot.slane %v248_v48, 1 }
 0x1ac   :  { %v250_v51 = vadd.f32 %v249_v49, %v248_v48 }
 0x1ae   :  { %v251_v52 = vmul.f32 0.125, %v250_v51 }
 0x1b0   :  { %348 = vmatmul.msk.f32.vlgmr.msra.gmra.mxu2 %vm36_vm0, %v251_v52 }
 0x21d   :  { %v145_v59 = vpop.f32.mrf.mxu3 }
 0x21e   :  { %v151_v60 = vmax.f32 %v145_v59, 0.0 }
 0x220   :  { %v220_v63 = vsel %vm36_vm0, %v151_v60, 0.0 }
 0x225   :  { %v148_v61 = vpop.f32.mrf.mxu3 }
 0x226   :  { %v152_v62 = vmax.f32 %v148_v61, 0.0 }
 0x228   :  { %v221_v0 = vsel %vm36_vm0, %v152_v62, 0.0 }
 0x229   :  { %v222_v1 = vadd.f32 %v221_v0, %v220_v63 }
 0x22b   :  { %v223_v2 = vrot.slane %v222_v1, 4 }
 0x22d   :  { %v224_v3 = vadd.f32 %v223_v2, %v222_v1 }
 0x22f   :  { %v225_v4 = vrot.slane %v224_v3, 2 }
 0x231   :  { %v226_v5 = vadd.f32 %v225_v4, %v224_v3 }
 0x233   :  { %v227_v6 = vrot.slane %v226_v5, 1  ;;  %v322_v13 = vpop.f32.mrf.mxu2 }
 0x235   :  { %v228_v7 = vadd.f32 %v227_v6, %v226_v5 }
 0x237   :  { %v229_v8 = vmul.f32 0.0625, %v228_v7 }
 0x239   :  { %347 = vmatmul.msk.f32.vlgmr.msra.gmra.mxu3 %vm36_vm0, %v229_v8 }
 0x2bc   :  { %v298_v10 = vpop.f32.mrf.mxu3 }
 0x2bd   :  { %v299_v11 = vadd.f32 %v298_v10, %v275_v9 }
 0x2bf   :  { %v325_v14 = vadd.f32 %v322_v13, %v299_v11 }
 0x2c1   :  { %v326_v15 = vadd.f32 %v325_v14, %v252_v12 }
 0x2c3   :  { %328 = vst.msk [vmem:[%s453_s4] sm:$0x1] %vm327_vm3, %v326_v15 }

</bundles_post_ra>
